<compile_context>
chip_gen: v7x
topology: tpu7x:2x2x1
jax: 0.10.0
libtpu: 0.0.40
codegen_flags: <defaults>
</compile_context>

<pallas_src>
import jax
import jax.numpy as jnp
from jax.experimental import pallas as pl
from jax.experimental.pallas import tpu as pltpu

_LANE = 128
_SUBLANE = 8


def _round_up(x, m):
    return ((x + m - 1) // m) * m


def _merger_kernel(x_ref, w_ref, b_ref, o_ref):
    # x_ref: [tb, Kp]  concatenated + zero-padded activations (per-tile block)
    # w_ref: [Kp, Hp]  pre-transposed, zero-padded weight (resident)
    # b_ref: [1,  Hp]  zero-padded bias (resident)
    # o_ref: [tb, Hp]  lane-dense output tile
    acc = jnp.dot(x_ref[...], w_ref[...], preferred_element_type=jnp.float32)
    o_ref[...] = (acc + b_ref[...].astype(jnp.float32)).astype(o_ref.dtype)


def prepare_merger_params(weight, bias):
    """Transpose + zero-pad the nn.Linear params once (hoisted out of the call path).

    weight: [hidden_dim, in_dim] (PyTorch nn.Linear layout); bias: [hidden_dim].
    Returns (w_padded [Kp, Hp], b_padded [1, Hp]) with Kp/Hp rounded up to 128.
    """
    H, D_in = weight.shape
    Hp = _round_up(H, _LANE)
    Kp = _round_up(D_in, _LANE)
    w_p = jnp.pad(jnp.transpose(weight), ((0, Kp - D_in), (0, Hp - H)))  # [Kp, Hp]
    b_p = jnp.pad(bias, (0, Hp - H)).reshape(1, Hp)                       # [1, Hp]
    return w_p, b_p


def merger_forward(ehr_embs, text_emb, w_padded, b_padded, hidden_dim,
                   *, batch_tile=2048, return_padded=False, use_pallas=True):
    """Pallas forward for Merger.

    ehr_embs: list of [B, ehr_embed_dim]; text_emb: [B, text_emb_dim].
    w_padded/b_padded: output of prepare_merger_params.
    Returns [B, hidden_dim] (or the padded [B, Hp] buffer if return_padded=True).
    """
    sources = list(ehr_embs) + [text_emb]
    B = int(sources[0].shape[0])
    D_in = sum(int(s.shape[1]) for s in sources)
    Kp, Hp = int(w_padded.shape[0]), int(w_padded.shape[1])
    assert Kp == _round_up(D_in, _LANE), "padded weight rows must match in_dim"
    assert Hp >= hidden_dim

    if use_pallas is None:
        # Tiny problems are pure launch/DMA overhead in a dedicated kernel.
        use_pallas = B * (D_in + hidden_dim) >= (1 << 18)
    if not use_pallas:
        x = jnp.concatenate(sources, axis=1)
        return x @ w_padded[:D_in, :hidden_dim] + b_padded[:, :hidden_dim]

    # Single lane-dense activation slab [B, Kp]: one wide DMA and one full-K
    # MXU pass per batch tile. Zero pad columns line up with zero weight rows.
    pad_cols = Kp - D_in
    parts = sources if pad_cols == 0 else sources + [
        jnp.zeros((B, pad_cols), sources[0].dtype)]
    x_slab = jnp.concatenate(parts, axis=1)  # [B, Kp]

    # Batch tiling: big tiles to amortize the ~0.35 us per-step overhead, but
    # at least 2 grid steps when B > 8 so both TensorCores get work on v7x.
    if B <= _SUBLANE:
        tb = B
    else:
        tb = min(int(batch_tile), _round_up(pl.cdiv(B, 2), _SUBLANE))
    grid = (pl.cdiv(B, tb),)

    # VMEM estimate (double-buffered x/out tiles + resident weight/bias);
    # raise the scoped limit only if a large batch_tile actually needs it.
    itemsize = jnp.dtype(x_slab.dtype).itemsize
    vmem_bytes = 2 * (tb * Kp + tb * Hp + Kp * Hp + Hp) * itemsize
    cp_kwargs = dict(dimension_semantics=("parallel",))
    if vmem_bytes > 12 * 1024 * 1024:
        cp_kwargs["vmem_limit_bytes"] = min(int(vmem_bytes * 3 // 2),
                                            64 * 1024 * 1024)

    out_padded = pl.pallas_call(
        _merger_kernel,
        out_shape=jax.ShapeDtypeStruct((B, Hp), x_slab.dtype),
        grid=grid,
        in_specs=[
            pl.BlockSpec((tb, Kp), lambda i: (i, 0)),   # activation tile
            pl.BlockSpec((Kp, Hp), lambda i: (0, 0)),   # weight, resident
            pl.BlockSpec((1, Hp), lambda i: (0, 0)),    # bias, resident
        ],
        out_specs=pl.BlockSpec((tb, Hp), lambda i: (i, 0)),
        compiler_params=pltpu.CompilerParams(**cp_kwargs),
    )(x_slab, w_padded, b_padded)

    if Hp == hidden_dim or return_padded:
        return out_padded
    # Slice off pad columns only when the consumer needs the exact PyTorch shape.
    return out_padded[:, :hidden_dim]


if __name__ == "__main__":
    # Small shapes implied by the module.
    batch = 8
    ehr_embed_dim = 16
    ehr_num = 3
    text_emb_dim = 32
    hidden_dim = 32
    in_dim = ehr_embed_dim * ehr_num + text_emb_dim  # 80

    key = jax.random.PRNGKey(0)
    k_ehr, k_txt, k_w, k_b = jax.random.split(key, 4)

    ehr_keys = jax.random.split(k_ehr, ehr_num)
    ehr_embs = [
        jax.random.normal(k, (batch, ehr_embed_dim), dtype=jnp.float32)
        for k in ehr_keys
    ]
    text_emb = jax.random.normal(k_txt, (batch, text_emb_dim), dtype=jnp.float32)

    # PyTorch nn.Linear default init: U(-1/sqrt(fan_in), +1/sqrt(fan_in)).
    bound = 1.0 / (in_dim ** 0.5)
    weight = jax.random.uniform(
        k_w, (hidden_dim, in_dim), minval=-bound, maxval=bound, dtype=jnp.float32
    )
    bias = jax.random.uniform(
        k_b, (hidden_dim,), minval=-bound, maxval=bound, dtype=jnp.float32
    )

    # Prepare (transpose + pad) the weights once.
    w_p, b_p = prepare_merger_params(weight, bias)

    # Case 1: the module's tiny default shapes (single-tile grid).
    out = merger_forward(ehr_embs, text_emb, w_p, b_p, hidden_dim,
                         use_pallas=True)
    jax.block_until_ready(out)

    x_cat = jnp.concatenate(ehr_embs + [text_emb], axis=1)
    ref = x_cat @ weight.T + bias[None, :]
    assert out.shape == (batch, hidden_dim)
    assert jnp.allclose(out, ref, atol=1e-5, rtol=1e-5)

    # Case 2: a ragged medium batch to exercise the multi-step (>=2 iterations,
    # OOB-masked last tile) grid path.
    B2 = 300
    k1, k2 = jax.random.split(jax.random.PRNGKey(1))
    ehr2 = [
        jax.random.normal(jax.random.fold_in(k1, i), (B2, ehr_embed_dim),
                          dtype=jnp.float32)
        for i in range(ehr_num)
    ]
    txt2 = jax.random.normal(k2, (B2, text_emb_dim), dtype=jnp.float32)
    out2 = merger_forward(ehr2, txt2, w_p, b_p, hidden_dim, use_pallas=True)
    jax.block_until_ready(out2)

    ref2 = jnp.concatenate(ehr2 + [txt2], axis=1) @ weight.T + bias[None, :]
    assert out2.shape == (B2, hidden_dim)
    assert jnp.allclose(out2, ref2, atol=1e-5, rtol=1e-5)

    print("KERNEL_OK")
</pallas_src>

<mosaic_0001>
module attributes {stable_mosaic.version = 11 : i64} {
  func.func @_merger_kernel(%arg0: i32, %arg1: memref<8x128xf32, #tpu.memory_space<vmem>>, %arg2: memref<128x128xf32, #tpu.memory_space<vmem>>, %arg3: memref<1x128xf32, #tpu.memory_space<vmem>>, %arg4: memref<8x128xf32, #tpu.memory_space<vmem>>) attributes {dimension_semantics = [#tpu.dimension_semantics<parallel>], iteration_bounds = array<i64: 1>, scalar_prefetch = 0 : i64, scratch_operands = 0 : i64, tpu.core_type = #tpu.core_type<tc>, window_params = [{transform_indices = @transform_0, window_bounds = array<i64: 8, 128>}, {pipeline_mode = #tpu.pipeline_mode<synchronous>, transform_indices = @transform_1, window_bounds = array<i64: 128, 128>}, {pipeline_mode = #tpu.pipeline_mode<synchronous>, transform_indices = @transform_2, window_bounds = array<i64: 1, 128>}, {transform_indices = @transform_3, window_bounds = array<i64: 8, 128>}]} {
    %c0 = arith.constant 0 : index
    %c0_0 = arith.constant 0 : index
    %0 = vector.load %arg1[%c0, %c0_0] : memref<8x128xf32, #tpu.memory_space<vmem>>, vector<8x128xf32>
    %c0_1 = arith.constant 0 : index
    %c0_2 = arith.constant 0 : index
    %1 = vector.load %arg2[%c0_1, %c0_2] : memref<128x128xf32, #tpu.memory_space<vmem>>, vector<128x128xf32>
    %cst = arith.constant dense<0.000000e+00> : vector<8x128xf32>
    %2 = tpu.matmul %0, %1, %cst {dimension_numbers = #tpu.dot_dimension_numbers<[1], [0], [0], [1], [0, 0, 1, 1], [], []>} : vector<8x128xf32>, vector<128x128xf32>, vector<8x128xf32> -> vector<8x128xf32>
    %c0_3 = arith.constant 0 : index
    %c0_4 = arith.constant 0 : index
    %3 = vector.load %arg3[%c0_3, %c0_4] : memref<1x128xf32, #tpu.memory_space<vmem>>, vector<1x128xf32>
    %4 = vector.broadcast %3 : vector<1x128xf32> to vector<8x128xf32>
    %5 = arith.addf %2, %4 : vector<8x128xf32>
    %c0_5 = arith.constant 0 : index
    %c0_6 = arith.constant 0 : index
    %6 = vector.load %arg4[%c0_5, %c0_6] : memref<8x128xf32, #tpu.memory_space<vmem>>, vector<8x128xf32>
    tpu.vector_store %arg4[%c0_5, %c0_6], %5 {strides = array<i32>} : memref<8x128xf32, #tpu.memory_space<vmem>>, vector<8x128xf32>,
    return
  }
  func.func @transform_0(%arg0: i32) -> (i32, i32) {
    %c0_i32 = arith.constant 0 : i32
    %c0_i32_0 = arith.constant 0 : i32
    return %arg0, %c0_i32 : i32, i32
  }
  func.func @transform_1(%arg0: i32) -> (i32, i32) {
    %c0_i32 = arith.constant 0 : i32
    %c0_i32_0 = arith.constant 0 : i32
    %c0_i32_1 = arith.constant 0 : i32
    return %c0_i32, %c0_i32_0 : i32, i32
  }
  func.func @transform_2(%arg0: i32) -> (i32, i32) {
    %c0_i32 = arith.constant 0 : i32
    %c0_i32_0 = arith.constant 0 : i32
    %c0_i32_1 = arith.constant 0 : i32
    return %c0_i32, %c0_i32_0 : i32, i32
  }
  func.func @transform_3(%arg0: i32) -> (i32, i32) {
    %c0_i32 = arith.constant 0 : i32
    %c0_i32_0 = arith.constant 0 : i32
    return %arg0, %c0_i32 : i32, i32
  }
}

</mosaic_0001>

<bundles_post_ra>
// kernel: tpu_custom_call.1
= control target key start
LH: loop header
LB: loop body
LE: loop exit
PB: predicated region body
PF: predicated region fallthrough
CT: control target
= control target key end

     0   :  { %8 = vsyncpa [#allocation3], 0  ;;  %s383_s0 = inlined_call_operand.hbm [shape: f32[8,128], index: 0, kind: input, shape index: {}]   ;;  %s384_s1 = inlined_call_operand.hbm [shape: f32[128,128], index: 1, kind: input, shape index: {}]   ;;  %s385_s2 = inlined_call_operand.vmem [shape: f32[1,128], index: 2, kind: input, shape index: {}]   ;;  %s386_s3 = inlined_call_operand.hbm [shape: f32[8,128], index: 3, kind: output, shape index: {}]  }
   0x1   :  { %9 = vsyncpa [#allocation6], 0 }
   0x2   :  { %10 = vsyncpa [#allocation4], 0  ;;  %s309_s12 = smov [#allocation2]   ;;  %s310_s14 = smov [#allocation5]  }
   0x3   :  { %s17_s13 = sshll.u32 %s309_s12, 4  ;;  %s26_s15 = sshll.u32 %s310_s14, 4  ;;  %s18_s13 = int_to_ptr.vmem [resolvable:$true] %s17_s13  ;;  %s337_s15 = int_to_ptr.vmem [resolvable:$true] %s26_s15 }
   0x4   :  { %s237_s18 = scalar_lea.hbm %s383_s0, 128 }
   0x5   :  { %p238_p0 = scmp.ne.s32.totalorder %s383_s0, %s237_s18  ;;  %p241_p1 = scmp.lt.u32.totalorder %s237_s18, %s383_s0 }
   0x7   :  { %p243_p2 = pnand %p241_p1, %p238_p0 }
   0x9   :  { %246 = shalt.err (!%p243_p2)
}
   0xa   :  { %s247_s23 = scalar_lea.vmem %s18_s13, 128  ;;  %p252_p4 = scmp.lt.s32.totalorder %s18_s13, %s18_s13 }
   0xb   :  { %p248_p3 = scmp.ne.s32.totalorder %s18_s13, %s247_s23  ;;  %p253_p5 = scmp.lt.s32.totalorder %s247_s23, %s247_s23 }
   0xd   :  { %p254_p6 = por %p253_p5, %p252_p4 }
   0xf   :  { %p255_p7 = pnand %p254_p6, %p248_p3 }
  0x11   :  { %258 = shalt.err (!%p255_p7)
}
  0x12   :  { %20 = dma.hbm_to_vmem [thread:$0]  %s383_s0, 128, %s18_s13, [#allocation3]  }
  0x13   :  { %s259_s28 = scalar_lea.hbm %s384_s1, 2048 }
  0x14   :  { %p260_p8 = scmp.ne.s32.totalorder %s384_s1, %s259_s28  ;;  %p263_p9 = scmp.lt.u32.totalorder %s259_s28, %s384_s1 }
  0x16   :  { %p265_p10 = pnand %p263_p9, %p260_p8 }
  0x18   :  { %268 = shalt.err (!%p265_p10)
}
  0x19   :  { %s269_s6 = scalar_lea.vmem %s337_s15, 2048  ;;  %p274_p12 = scmp.lt.s32.totalorder %s337_s15, %s337_s15 }
  0x1a   :  { %p270_p11 = scmp.ne.s32.totalorder %s337_s15, %s269_s6  ;;  %p275_p13 = scmp.lt.s32.totalorder %s269_s6, %s269_s6 }
  0x1c   :  { %p276_p0 = por %p275_p13, %p274_p12 }
  0x1e   :  { %p277_p1 = pnand %p276_p0, %p270_p11 }
  0x20   :  { %280 = shalt.err (!%p277_p1)
}
  0x21   :  { %s311_s0 = smov 128   ;;  %s312_s7 = smov 8  }
  0x22   :  { %32 = dma.hbm_to_vmem [thread:$0]  %s384_s1, 2048, %s337_s15, [#allocation6], %s311_s0, %s311_s0, %s312_s7  }
  0x23   :  { %303 = dma.done.wait [#allocation3], 128  }
  0x24   :  { %304 = vsyncadd [#allocation3], 4294967168 }
  0x25   :  { %305 = dma.done.wait [#allocation6], 2048  }
  0x26   :  { %306 = vsyncadd [#allocation6], 4294965248  ;;  %v313_v0 = vmov 0.0|0.0   ;;  %vm314_vm0 = vmmov 0   ;;  %v315_v1 = vmov 0.0   ;;  %v42_v2 = vld [vmem:[#allocation5] sm:$0xff] }
  0x27   :  { %205 = vmatprep.subr.bf16.mxu0 %v313_v0  ;;  %202 = vmatprep.mubr.msk.f32.mxu0 %vm314_vm0, %v315_v1  ;;  %v43_v3 = vld [vmem:[#allocation5 + $0x8] sm:$0xff]  ;;  %v44_v4 = vld [vmem:[#allocation5 + $0x10] sm:$0xff]  ;;  %v45_v6 = vld [vmem:[#allocation5 + $0x18] sm:$0xff]  ;;  %s316_s11 = smov [#allocation7]  }
  0x28   :  { %v206_v5 = vpack.c.bf16 %v43_v3, %v42_v2  ;;  %v209_v7 = vpack.c.bf16 %v45_v6, %v44_v4  ;;  %v46_v8 = vld [vmem:[#allocation5 + $0x20] sm:$0xff]  ;;  %v47_v9 = vld [vmem:[#allocation5 + $0x28] sm:$0xff]  ;;  %v48_v11 = vld [vmem:[#allocation5 + $0x30] sm:$0xff]  ;;  %s142_s12 = sshll.u32 %s316_s11, 4  ;;  %s143_s12 = int_to_ptr.vmem [resolvable:$true] %s142_s12 }
  0x29   :  { %v212_v10 = vpack.c.bf16 %v47_v9, %v46_v8  ;;  %v49_v12 = vld [vmem:[#allocation5 + $0x38] sm:$0xff]  ;;  %v50_v14 = vld [vmem:[#allocation5 + $0x40] sm:$0xff]  ;;  %v51_v15 = vld [vmem:[#allocation5 + $0x48] sm:$0xff]  ;;  %s281_s13 = scalar_lea.vmem %s143_s12, 128  ;;  %p286_p3 = scmp.lt.s32.totalorder %s143_s12, %s143_s12 }
  0x2a   :  { %207 = vmatpush3.bf16.msra.mxu0 %v206_v5  ;;  %v215_v13 = vpack.c.bf16 %v49_v12, %v48_v11  ;;  %v218_v16 = vpack.c.bf16 %v51_v15, %v50_v14  ;;  %v52_v17 = vld [vmem:[#allocation5 + $0x50] sm:$0xff]  ;;  %v53_v18 = vld [vmem:[#allocation5 + $0x58] sm:$0xff]  ;;  %v54_v20 = vld [vmem:[#allocation5 + $0x60] sm:$0xff]  ;;  %p282_p2 = scmp.ne.s32.totalorder %s143_s12, %s281_s13  ;;  %p287_p4 = scmp.lt.s32.totalorder %s281_s13, %s281_s13 }
  0x2b   :  { %208 = vmatprep.subr.bf16.mxu0 %v313_v0  ;;  %v221_v19 = vpack.c.bf16 %v53_v18, %v52_v17  ;;  %v55_v21 = vld [vmem:[#allocation5 + $0x68] sm:$0xff]  ;;  %v56_v23 = vld [vmem:[#allocation5 + $0x70] sm:$0xff]  ;;  %v57_v24 = vld [vmem:[#allocation5 + $0x78] sm:$0xff] }
  0x2c   :  { %v224_v22 = vpack.c.bf16 %v55_v21, %v54_v20  ;;  %v227_v25 = vpack.c.bf16 %v57_v24, %v56_v23  ;;  %v41_v26 = vld [vmem:[#allocation2] sm:$0xff]  ;;  %p288_p5 = por %p287_p4, %p286_p3 }
  0x2d   :  { %v152_v27 = vld [vmem:[%s385_s2] ss:$0 sm:$0xff] }
  0x2e   :  { %210 = vmatpush3.bf16.msra.mxu0 %v209_v7  ;;  %p289_p6 = pnand %p288_p5, %p282_p2 }
  0x2f   :  { %211 = vmatprep.subr.bf16.mxu0 %v313_v0 }
  0x32   :  { %213 = vmatpush3.bf16.msra.mxu0 %v212_v10 }
  0x33   :  { %214 = vmatprep.subr.bf16.mxu0 %v313_v0 }
  0x36   :  { %216 = vmatpush3.bf16.msra.mxu0 %v215_v13 }
  0x37   :  { %217 = vmatprep.subr.bf16.mxu0 %v313_v0 }
  0x3a   :  { %219 = vmatpush3.bf16.msra.mxu0 %v218_v16 }
  0x3b   :  { %220 = vmatprep.subr.bf16.mxu0 %v313_v0 }
  0x3e   :  { %222 = vmatpush3.bf16.msra.mxu0 %v221_v19 }
  0x3f   :  { %223 = vmatprep.subr.bf16.mxu0 %v313_v0 }
  0x42   :  { %225 = vmatpush3.bf16.msra.mxu0 %v224_v22 }
  0x43   :  { %226 = vmatprep.subr.bf16.mxu0 %v313_v0 }
  0x46   :  { %228 = vmatpush3.bf16.msra.mxu0 %v227_v25 }
  0x49   :  { %203 = vmatmul.mubr.f32.vlgmr.msra.gmra.mrb[0].mxu0 %v41_v26 }
 0x11c   :  { %v131_v28 = vpop.f32.mrb[0].mxu0 }
 0x11d   :  { %v132_v29 = vadd.f32 %v152_v27, %v131_v28  ;;  %v204_v30 = vpop.f32.mrb[1].mxu0 }
 0x11f   :  { %135 = vst [vmem:[#allocation7] sm:$0xff] %v132_v29 }
 0x120   :  { %292 = shalt.err (!%p289_p6)
}
 0x121   :  { %s293_s16 = scalar_lea.hbm %s386_s3, 128 }
 0x122   :  { %p294_p7 = scmp.ne.s32.totalorder %s386_s3, %s293_s16  ;;  %p297_p8 = scmp.lt.u32.totalorder %s293_s16, %s386_s3 }
 0x124   :  { %p299_p9 = pnand %p297_p8, %p294_p7 }
 0x126   :  { %302 = shalt.err (!%p299_p9)
}
 0x127   :  { %145 = dma.vmem_to_hbm [thread:$0]  %s143_s12, 128, %s386_s3, [#allocation4]  }
 0x128   :  { %307 = dma.done.wait [#allocation4], 128  }
 0x129   :  { %308 = vsyncadd [#allocation4], 4294967168 }
 0x12a   :  { %149 = vsyncpa [#allocation3], 1 }
 0x12b   :  { %150 = vsyncpa [#allocation6], 1 }
 0x12c   :  { %151 = vsyncpa [#allocation4], 1 }

</bundles_post_ra>
